<compile_context>
chip_gen: v7x
topology: tpu7x:2x2x1
jax: 0.10.0
libtpu: 0.0.40
codegen_flags: <defaults>
</compile_context>

<pallas_src>
import jax
import jax.numpy as jnp
from jax.experimental import pallas as pl
from jax.experimental.pallas import tpu as pltpu


def _round_up(v, m):
    return ((v + m - 1) // m) * m


# --------------------------------------------------------------------------------------
# Pallas kernel: tiled A_hat @ xw matvec (reduction over k) + fused elementwise epilogue.
# --------------------------------------------------------------------------------------
def graph_sca3d_kernel(xwT_ref, ahat_ref, x_ref, cf_ref, bg_ref, out_ref, acc_ref):
    k = pl.program_id(1)

    @pl.when(k == 0)
    def _init():
        acc_ref[...] = jnp.zeros_like(acc_ref)

    # acc[m] += sum_k A_hat[m, k] * xw[k]   (VPU multiply + XLU lane reduce, f32 accumulate)
    a = ahat_ref[...].astype(jnp.float32)                                  # [TM, TK]
    acc_ref[...] += jnp.sum(a * xwT_ref[...], axis=-1, keepdims=True)      # [TM, 1]

    @pl.when(k == pl.num_programs(1) - 1)
    def _finalize():
        z = acc_ref[...] + bg_ref[0, 0]                                    # GCN bias
        spa = 1.0 / (1.0 + jnp.exp(-z))                                    # sigmoid gate [TM,1]
        # spa_se + x + chn_se  ==  x * (spa + 1 + chn_gate)  ==  x * (cf + spa)
        out_ref[...] = x_ref[...] * (cf_ref[...] + spa)


# --------------------------------------------------------------------------------------
# Graph densification glue (segment-mean projector + sym-normalized adjacency, PyG gcn_norm).
# --------------------------------------------------------------------------------------
def _graph_structure(batch, edge_index, BN, num_graphs):
    onehot = jax.nn.one_hot(batch, num_graphs, dtype=jnp.float32)          # [BN, B]
    counts = jnp.clip(jnp.sum(onehot, axis=0), 1.0, None)                  # [B]
    pmean = onehot.T / counts[:, None]                                     # [B, BN]

    # Dense symmetric-normalized adjacency with self loops.
    # Note: duplicate edges accumulate weight > 1 (matches this reference; PyG may coalesce).
    src, dst = edge_index[0], edge_index[1]
    A = jnp.zeros((BN, BN), jnp.float32).at[dst, src].add(1.0)
    A = A + jnp.eye(BN, dtype=jnp.float32)
    deg = jnp.sum(A, axis=1)
    dinv = jnp.where(deg > 0, 1.0 / jnp.sqrt(deg), 0.0)
    ahat = A * dinv[:, None] * dinv[None, :]
    return pmean, ahat


# --------------------------------------------------------------------------------------
# Wrapper: hoisted channel branch + tiled pallas_call.
# --------------------------------------------------------------------------------------
def graph_sca3d(x, batch, edge_index, params, num_graphs, *, tm_max=512, tk_max=1024):
    w1, b1, w2, b2, wg, bg = params
    BN, C = x.shape
    x = x.astype(jnp.float32)

    pmean, ahat = _graph_structure(batch, edge_index, BN, num_graphs)

    # ---- hoisted glue: O(B*C) / O(BN*C), trivial next to the O(BN^2) adjacency stream ----
    chn_mean = pmean @ x                                                   # scatter_mean  [B, C]
    h = jnp.maximum(chn_mean @ w1 + b1, 0.0)
    cexc = jax.nn.sigmoid(h @ w2 + b2)                                     # channel gate  [B, C]
    cf = 1.0 + cexc[batch]                                                 # 1 + gather    [BN, C]
    xwT = (x @ wg).reshape(1, BN)                                          # GCN projection, lane-major

    # ---- tiling: TM x TK tiles of A_hat (bf16 stream, f32 accumulate) ----
    TM = tm_max if BN >= tm_max else _round_up(BN, 16)
    TK = tk_max if BN >= tk_max else _round_up(BN, 128)
    BNr = _round_up(BN, TM)                      # padded rows  (node / output dim)
    BNc = _round_up(BN, TK)                      # padded cols  (reduction dim)

    ahat_p = jnp.zeros((BNr, BNc), jnp.bfloat16).at[:BN, :BN].set(ahat.astype(jnp.bfloat16))
    xwT_p = jnp.zeros((1, BNc), jnp.float32).at[:, :BN].set(xwT)
    x_p = jnp.zeros((BNr, C), jnp.float32).at[:BN].set(x)
    cf_p = jnp.zeros((BNr, C), jnp.float32).at[:BN].set(cf)
    bg_s = jnp.reshape(bg, (1, 1)).astype(jnp.float32)

    grid = (BNr // TM, BNc // TK)

    # Explicit scoped-VMEM budget (bounded per step, independent of BN).
    lane = 128
    vmem_est = (2 * TM * TK * 2                  # ahat blocks (bf16, double-buffered)
                + 2 * 8 * TK * 4                 # xw row blocks
                + 2 * 3 * TM * max(C, lane) * 4  # x, cf, out blocks (lane-padded)
                + TM * lane * 4)                 # accumulator scratch
    compiler_params = pltpu.CompilerParams(
        dimension_semantics=("parallel", "arbitrary"),
        vmem_limit_bytes=int(min(48 * 2**20, max(8 * 2**20, 4 * vmem_est))),
    )
    cost = pl.CostEstimate(
        flops=int(2 * BNr * BNc + 4 * BNr * C),
        transcendentals=int(BNr),
        bytes_accessed=int(BNr * BNc * 2 + (3 * BNr * C + BNc) * 4),
    )

    out_p = pl.pallas_call(
        graph_sca3d_kernel,
        out_shape=jax.ShapeDtypeStruct((BNr, C), jnp.float32),
        grid_spec=pltpu.PrefetchScalarGridSpec(
            num_scalar_prefetch=0,
            grid=grid,
            in_specs=[
                pl.BlockSpec((1, TK), lambda m, k: (0, k)),           # xw row vector
                pl.BlockSpec((TM, TK), lambda m, k: (m, k)),          # A_hat tile (bf16)
                pl.BlockSpec((TM, C), lambda m, k: (m, 0)),           # x rows
                pl.BlockSpec((TM, C), lambda m, k: (m, 0)),           # 1 + channel gate rows
                pl.BlockSpec(memory_space=pltpu.MemorySpace.SMEM),    # bg scalar
            ],
            out_specs=pl.BlockSpec((TM, C), lambda m, k: (m, 0)),
            scratch_shapes=[pltpu.VMEM((TM, 1), jnp.float32)],
        ),
        compiler_params=compiler_params,
        cost_estimate=cost,
    )(xwT_p, ahat_p, x_p, cf_p, bg_s)

    return out_p[:BN]


# --------------------------------------------------------------------------------------
# Pure-JAX reference (mirrors the PyTorch forward semantics, full f32).
# --------------------------------------------------------------------------------------
def ref_forward(x, batch, edge_index, params, num_graphs):
    w1, b1, w2, b2, wg, bg = params
    pmean, ahat = _graph_structure(batch, edge_index, x.shape[0], num_graphs)
    chn_mean = pmean @ x
    h = jnp.maximum(chn_mean @ w1 + b1, 0.0)
    cexc = jax.nn.sigmoid(h @ w2 + b2)
    chn_se = x * cexc[batch]
    spa = jax.nn.sigmoid(ahat @ (x @ wg) + bg)
    spa_se = x * spa
    return spa_se + x + chn_se


if __name__ == "__main__":
    key = jax.random.PRNGKey(0)
    BN, C, B, reduction = 16, 8, 2, 2            # 2 graphs x 8 nodes, 8 channels
    Cr = C // reduction
    E = 32

    ks = jax.random.split(key, 8)
    x = jax.random.normal(ks[0], (BN, C), jnp.float32)
    batch = jnp.repeat(jnp.arange(B, dtype=jnp.int32), BN // B)          # [BN]
    # random edges, each confined to its own graph
    src = jax.random.randint(ks[1], (E,), 0, BN // B)
    dst = jax.random.randint(ks[2], (E,), 0, BN // B)
    goff = jax.random.randint(ks[3], (E,), 0, B) * (BN // B)
    edge_index = jnp.stack([src + goff, dst + goff], axis=0).astype(jnp.int32)

    # synthetic parameters: Linear(C,C//r) -> ReLU -> Linear(C//r,C); GCNConv(C,1)
    w1 = jax.random.normal(ks[4], (C, Cr), jnp.float32) * 0.3
    b1 = jnp.full((1, Cr), 0.10, jnp.float32)
    w2 = jax.random.normal(ks[5], (Cr, C), jnp.float32) * 0.3
    b2 = jnp.full((1, C), -0.05, jnp.float32)
    wg = jax.random.normal(ks[6], (C, 1), jnp.float32) * 0.3
    bg = jnp.full((1, 1), 0.02, jnp.float32)
    params = (w1, b1, w2, b2, wg, bg)

    out = graph_sca3d(x, batch, edge_index, params, B)
    out = jax.block_until_ready(out)

    ref = ref_forward(x, batch, edge_index, params, B)
    assert out.shape == (BN, C)
    # tolerance loosened vs. pure-f32 because A_hat is streamed in bf16 (sigmoid damps the error)
    assert jnp.allclose(out, ref, atol=1e-2, rtol=1e-2), float(jnp.max(jnp.abs(out - ref)))
    print("KERNEL_OK")
</pallas_src>

<mosaic_0001>
module attributes {stable_mosaic.version = 11 : i64} {
  func.func @graph_sca3d_kernel(%arg0: i32, %arg1: i32, %arg2: memref<1x128xf32, #tpu.memory_space<vmem>>, %arg3: memref<16x128xbf16, #tpu.memory_space<vmem>>, %arg4: memref<16x8xf32, #tpu.memory_space<vmem>>, %arg5: memref<16x8xf32, #tpu.memory_space<vmem>>, %arg6: memref<1x1xf32, #tpu.memory_space<smem>>, %arg7: memref<16x8xf32, #tpu.memory_space<vmem>>, %arg8: memref<16x1xf32, #tpu.memory_space<vmem>>) attributes {dimension_semantics = [#tpu.dimension_semantics<parallel>, #tpu.dimension_semantics<arbitrary>], iteration_bounds = array<i64: 1, 1>, scalar_prefetch = 0 : i64, scratch_operands = 1 : i64, tpu.core_type = #tpu.core_type<tc>, window_params = [{transform_indices = @transform_0, window_bounds = array<i64: 1, 128>}, {transform_indices = @transform_1, window_bounds = array<i64: 16, 128>}, {transform_indices = @transform_2, window_bounds = array<i64: 16, 8>}, {transform_indices = @transform_3, window_bounds = array<i64: 16, 8>}, {transform_indices = @transform_4, window_bounds = array<i64: 1, 1>}, {transform_indices = @transform_5, window_bounds = array<i64: 16, 8>}]} {
    %c0_i32 = arith.constant 0 : i32
    %0 = arith.cmpi eq, %arg1, %c0_i32 : i32
    %1 = arith.extui %0 : i1 to i32
    %c0_i32_0 = arith.constant 0 : i32
    %2 = arith.cmpi ne, %1, %c0_i32_0 : i32
    scf.if %2 {
      %cst_10 = arith.constant 0.000000e+00 : f32
      %16 = vector.broadcast %cst_10 : f32 to vector<16x1xf32>
      %c0_11 = arith.constant 0 : index
      %c0_12 = arith.constant 0 : index
      %17 = vector.load %arg8[%c0_11, %c0_12] : memref<16x1xf32, #tpu.memory_space<vmem>>, vector<16x1xf32>
      tpu.vector_store %arg8[%c0_11, %c0_12], %16 {strides = array<i32>} : memref<16x1xf32, #tpu.memory_space<vmem>>, vector<16x1xf32>,
    } else {
    }
    %c0 = arith.constant 0 : index
    %c0_1 = arith.constant 0 : index
    %3 = vector.load %arg3[%c0, %c0_1] : memref<16x128xbf16, #tpu.memory_space<vmem>>, vector<16x128xbf16>
    %4 = arith.extf %3 : vector<16x128xbf16> to vector<16x128xf32>
    %c0_2 = arith.constant 0 : index
    %c0_3 = arith.constant 0 : index
    %5 = vector.load %arg8[%c0_2, %c0_3] : memref<16x1xf32, #tpu.memory_space<vmem>>, vector<16x1xf32>
    %c0_4 = arith.constant 0 : index
    %c0_5 = arith.constant 0 : index
    %6 = vector.load %arg2[%c0_4, %c0_5] : memref<1x128xf32, #tpu.memory_space<vmem>>, vector<1x128xf32>
    %7 = vector.broadcast %6 : vector<1x128xf32> to vector<16x128xf32>
    %8 = arith.mulf %4, %7 : vector<16x128xf32>
    %cst = arith.constant dense<0.000000e+00> : vector<16xf32>
    %9 = vector.multi_reduction <add>, %8, %cst [1] : vector<16x128xf32> to vector<16xf32>
    %10 = vector.shape_cast %9 : vector<16xf32> to vector<16x1xf32>
    %11 = arith.addf %5, %10 : vector<16x1xf32>
    %c0_6 = arith.constant 0 : index
    %c0_7 = arith.constant 0 : index
    %12 = vector.load %arg8[%c0_6, %c0_7] : memref<16x1xf32, #tpu.memory_space<vmem>>, vector<16x1xf32>
    tpu.vector_store %arg8[%c0_6, %c0_7], %11 {strides = array<i32>} : memref<16x1xf32, #tpu.memory_space<vmem>>, vector<16x1xf32>,
    %c0_i32_8 = arith.constant 0 : i32
    %13 = arith.cmpi eq, %arg1, %c0_i32_8 : i32
    %14 = arith.extui %13 : i1 to i32
    %c0_i32_9 = arith.constant 0 : i32
    %15 = arith.cmpi ne, %14, %c0_i32_9 : i32
    scf.if %15 {
      %c0_10 = arith.constant 0 : index
      %c0_11 = arith.constant 0 : index
      %16 = vector.load %arg8[%c0_10, %c0_11] : memref<16x1xf32, #tpu.memory_space<vmem>>, vector<16x1xf32>
      %c0_12 = arith.constant 0 : index
      %c0_13 = arith.constant 0 : index
      %17 = memref.load %arg6[%c0_12, %c0_13] : memref<1x1xf32, #tpu.memory_space<smem>>
      %18 = vector.broadcast %17 : f32 to vector<16x1xf32>
      %19 = arith.addf %16, %18 : vector<16x1xf32>
      %cst_14 = arith.constant 0.000000e+00 : f32
      %20 = vector.broadcast %cst_14 : f32 to vector<16x1xf32>
      %21 = arith.subf %20, %19 : vector<16x1xf32>
      %22 = math.exp %21 : vector<16x1xf32>
      %cst_15 = arith.constant 1.000000e+00 : f32
      %23 = vector.broadcast %cst_15 : f32 to vector<16x1xf32>
      %24 = arith.addf %23, %22 : vector<16x1xf32>
      %cst_16 = arith.constant 1.000000e+00 : f32
      %25 = vector.broadcast %cst_16 : f32 to vector<16x1xf32>
      %26 = arith.divf %25, %24 : vector<16x1xf32>
      %c0_17 = arith.constant 0 : index
      %c0_18 = arith.constant 0 : index
      %27 = vector.load %arg4[%c0_17, %c0_18] : memref<16x8xf32, #tpu.memory_space<vmem>>, vector<16x8xf32>
      %c0_19 = arith.constant 0 : index
      %c0_20 = arith.constant 0 : index
      %28 = vector.load %arg5[%c0_19, %c0_20] : memref<16x8xf32, #tpu.memory_space<vmem>>, vector<16x8xf32>
      %29 = vector.broadcast %26 : vector<16x1xf32> to vector<16x8xf32>
      %30 = arith.addf %28, %29 : vector<16x8xf32>
      %31 = arith.mulf %27, %30 : vector<16x8xf32>
      %c0_21 = arith.constant 0 : index
      %c0_22 = arith.constant 0 : index
      %32 = vector.load %arg7[%c0_21, %c0_22] : memref<16x8xf32, #tpu.memory_space<vmem>>, vector<16x8xf32>
      tpu.vector_store %arg7[%c0_21, %c0_22], %31 {strides = array<i32>} : memref<16x8xf32, #tpu.memory_space<vmem>>, vector<16x8xf32>,
    } else {
    }
    return
  }
  func.func @transform_0(%arg0: i32, %arg1: i32) -> (i32, i32) {
    %c0_i32 = arith.constant 0 : i32
    %c0_i32_0 = arith.constant 0 : i32
    return %c0_i32, %arg1 : i32, i32
  }
  func.func @transform_1(%arg0: i32, %arg1: i32) -> (i32, i32) {
    %c0_i32 = arith.constant 0 : i32
    return %arg0, %arg1 : i32, i32
  }
  func.func @transform_2(%arg0: i32, %arg1: i32) -> (i32, i32) {
    %c0_i32 = arith.constant 0 : i32
    %c0_i32_0 = arith.constant 0 : i32
    return %arg0, %c0_i32 : i32, i32
  }
  func.func @transform_3(%arg0: i32, %arg1: i32) -> (i32, i32) {
    %c0_i32 = arith.constant 0 : i32
    %c0_i32_0 = arith.constant 0 : i32
    return %arg0, %c0_i32 : i32, i32
  }
  func.func @transform_4(%arg0: i32, %arg1: i32) -> (i32, i32) {
    %c0_i32 = arith.constant 0 : i32
    %c0_i32_0 = arith.constant 0 : i32
    %c0_i32_1 = arith.constant 0 : i32
    return %c0_i32, %c0_i32_0 : i32, i32
  }
  func.func @transform_5(%arg0: i32, %arg1: i32) -> (i32, i32) {
    %c0_i32 = arith.constant 0 : i32
    %c0_i32_0 = arith.constant 0 : i32
    return %arg0, %c0_i32 : i32, i32
  }
}

</mosaic_0001>

<bundles_post_ra>
// kernel: tpu_custom_call.1
= control target key start
LH: loop header
LB: loop body
LE: loop exit
PB: predicated region body
PF: predicated region fallthrough
CT: control target
= control target key end

     0   :  { %vm25_vm0 = vcmask 7168   ;;  %v115_v2 = vmov 0.0   ;;  %v116_v7 = vmov 0   ;;  %vm91_vm1 = vcmask 64512   ;;  %s178_s0 = inlined_call_operand.vmem [shape: f32[1,128], index: 0, kind: input, shape index: {}]   ;;  %s179_s1 = inlined_call_operand.vmem [shape: bf16[16,128], index: 1, kind: input, shape index: {}]   ;;  %s180_s4 = inlined_call_operand.<no memory space> [shape: f32[1,1], index: 4, kind: input, shape index: {}]   ;;  %s181_s3 = inlined_call_operand.vmem [shape: f32[16,8], index: 3, kind: input, shape index: {}]   ;;  %s182_s2 = inlined_call_operand.vmem [shape: f32[16,8], index: 2, kind: input, shape index: {}]   ;;  %s183_s5 = inlined_call_operand.vmem [shape: f32[16,8], index: 5, kind: output, shape index: {}]  }
   0x1   :  { %v100_v0 = vld [vmem:[%s179_s1] sm:$0xff]   ;;  %26 = vst.msk [vmem:[#allocation2] sm:$0xff] %vm25_vm0, %v115_v2  ;;  %27 = vst.msk [vmem:[#allocation2 + $0x8] sm:$0xff] %vm25_vm0, %v115_v2  ;;  %105 = vset.pattern.permute.xlu1 %v116_v7  ;;  %106 = vset.pattern.permute.xlu0 %v116_v7  ;;  %v58_v14 = vstv %s180_s4  ;;  %v76_v33 = vld [vmem:[%s181_s3 + $0x8] sm:$0xff] }
   0x2   :  { %v98_v1 = vld [vmem:[%s178_s0] ss:$0 sm:$0xff]  ;;  %v101_v3 = vunpack.c.l.bf16 %v100_v0  ;;  %v102_v4 = vunpack.c.h.bf16 %v100_v0  ;;  %v74_v35 = vld [vmem:[%s182_s2 + $0x8] sm:$0xff] }
   0x3   :  { %v75_v29 = vld [vmem:[%s181_s3] sm:$0xff] }
   0x4   :  { %v41_v5 = vmul.f32 %v101_v3, %v98_v1  ;;  %v42_v6 = vmul.f32 %v102_v4, %v98_v1  ;;  %v73_v30 = vld [vmem:[%s182_s2] sm:$0xff] }
   0x6   :  { %43 = vadd.xlane.f32.xlu0 %v41_v5 }
   0x8   :  { %v32_v8 = vld [vmem:[#allocation2] sm:$0xff]  ;;  %v33_v11 = vld [vmem:[#allocation2 + $0x8] sm:$0xff] }
   0xa   :  { %45 = vadd.xlane.f32.xlu0 %v42_v6 }
  0x93   :  { %v44_v9 = vpop.xlane.xlu0 %43 }
  0x94   :  { %v47_v10 = vadd.f32 %v44_v9, %v32_v8 }
  0x96   :  { %50 = vst.msk [vmem:[#allocation2] sm:$0xff] %vm25_vm0, %v47_v10 }
  0x97   :  { %v46_v12 = vpop.xlane.xlu0 %45 }
  0x98   :  { %v48_v13 = vadd.f32 %v46_v12, %v33_v11 }
  0x9a   :  { %51 = vst.msk [vmem:[#allocation2 + $0x8] sm:$0xff] %vm25_vm0, %v48_v13 }
  0x9d   :  { %v55_v15 = vld [vmem:[#allocation2] sm:$0xff] }
  0x9e   :  { %v59_v16 = vadd.f32 %v58_v14, %v55_v15 }
  0xa0   :  { %v61_v17 = vsub.f32 0.0, %v59_v16 }
  0xa1   :  { %v56_v18 = vld [vmem:[#allocation2 + $0x8] sm:$0xff] }
  0xa2   :  { %v63_v19 = vmul.f32 1.442695, %v61_v17  ;;  %v60_v20 = vadd.f32 %v58_v14, %v56_v18 }
  0xa4   :  { %107 = vpow2.f32 %v63_v19  ;;  %v62_v21 = vsub.f32 0.0, %v60_v20 }
  0xa6   :  { %v65_v22 = vmul.f32 1.442695, %v62_v21 }
  0xa8   :  { %109 = vpow2.f32 %v65_v22 }
  0xae   :  { %v108_v23 = vpop.eup %107 }
  0xaf   :  { %v67_v24 = vadd.f32 1.0, %v108_v23 }
  0xb1   :  { %111 = vrcp.f32 %v67_v24 }
  0xb2   :  { %v110_v25 = vpop.eup %109 }
  0xb3   :  { %v68_v26 = vadd.f32 1.0, %v110_v25 }
  0xb5   :  { %113 = vrcp.f32 %v68_v26 }
  0xbb   :  { %v112_v27 = vpop.eup %111 }
  0xbc   :  { %79 = vperm.xlu1 %105, %v112_v27  }
  0xbf   :  { %v114_v28 = vpop.eup %113 }
  0xc0   :  { %84 = vperm.xlu1 %105, %v114_v28  }
 0x13b   :  { %v80_v31 = vpop.permute.xlu1 %79 }
 0x13c   :  { %v87_v32 = vadd.f32 %v80_v31, %v75_v29 }
 0x13e   :  { %v89_v34 = vmul.f32 %v87_v32, %v73_v30 }
 0x13f   :  { %v85_v36 = vpop.permute.xlu1 %84 }
 0x140   :  { %92 = vst.msk [vmem:[%s183_s5] sm:$0xff] %vm91_vm1, %v89_v34  ;;  %v88_v37 = vadd.f32 %v85_v36, %v76_v33 }
 0x142   :  { %v90_v38 = vmul.f32 %v88_v37, %v74_v35 }
 0x144   :  { %93 = vst.msk [vmem:[%s183_s5 + $0x8] sm:$0xff] %vm91_vm1, %v90_v38 }

</bundles_post_ra>
